<compile_context>
chip_gen: v6e
topology: v6e:2x2x1
jax: 0.10.0
libtpu: 0.0.40
codegen_flags: <defaults>
</compile_context>

<pallas_src>
import functools

import jax
import jax.numpy as jnp
from jax.experimental import pallas as pl
from jax.experimental.pallas import tpu as pltpu


# ----------------------------------------------------------------------------
# Config (mirrors self.cfg.layers / self.cfg.init_type of the torch module)
# ----------------------------------------------------------------------------
class Cfg:
    def __init__(self, layers, init_type):
        self.layers = layers
        self.init_type = init_type


CFG = Cfg(
    layers=[
        ("Flatten", {}),
        ("Linear", {"in_features": 16 * 16, "out_features": 32}),
        ("ReLU", {}),
        ("Linear", {"in_features": 32, "out_features": 10}),
    ],
    init_type="xavier_uniform",
)


# ----------------------------------------------------------------------------
# Deterministic parameter init (stands in for _init_weights / getattr(nn.init, ...))
# ----------------------------------------------------------------------------
def _xavier_uniform(key, shape, dtype=jnp.float32):
    fan_out, fan_in = shape  # PyTorch Linear weight is (out_features, in_features)
    limit = (6.0 / (fan_in + fan_out)) ** 0.5
    return jax.random.uniform(key, shape, dtype, minval=-limit, maxval=limit)


def init_params(cfg, key):
    """Returns [(W(out,in), b(out,)), ...] for every Linear layer in cfg order."""
    params = []
    for name, kw in cfg.layers:
        if name == "Linear":
            key, wk = jax.random.split(key)
            w = _xavier_uniform(wk, (kw["out_features"], kw["in_features"]))
            b = jnp.zeros((kw["out_features"],), jnp.float32)
            params.append((w, b))
    return params


# ----------------------------------------------------------------------------
# Activations supported in-kernel (elementwise only)
# ----------------------------------------------------------------------------
_ACTS = {
    "ReLU": lambda x: jnp.maximum(x, 0.0),
    "Tanh": jnp.tanh,
    "Sigmoid": jax.nn.sigmoid,
    "GELU": jax.nn.gelu,
    "Identity": lambda x: x,
}

_LANE = 128
_SUBLANE = 8


def _round_up(x, m):
    return (x + m - 1) // m * m


# ----------------------------------------------------------------------------
# One-time parameter preparation (hoisted out of the forward path)
# ----------------------------------------------------------------------------
def prepare_model(cfg, params, matmul_dtype=jnp.bfloat16):
    """Transpose / lane-pad / cast parameters once; returns a static model dict."""
    layer_names = [n for n, _ in cfg.layers if n != "Flatten"]

    linear_cfgs = [kw for n, kw in cfg.layers if n == "Linear"]
    in_feat = linear_cfgs[0]["in_features"]
    n_classes = linear_cfgs[-1]["out_features"]

    in_pad0 = _round_up(in_feat, _LANE)

    padded = []
    cur_in_pad = in_pad0
    flops_per_row = 0
    for (w, b) in params:
        out_f, in_f = w.shape
        out_pad = _round_up(out_f, _LANE)
        # (in_pad, out_pad) with zeros outside the real block; bf16 for the MXU.
        w_p = jnp.zeros((cur_in_pad, out_pad), matmul_dtype)
        w_p = w_p.at[:in_f, :out_f].set(jnp.transpose(w).astype(matmul_dtype))
        # bias kept in f32 (added after f32 accumulation), shape (1, out_pad).
        b_p = jnp.zeros((1, out_pad), jnp.float32)
        b_p = b_p.at[:, :out_f].set(b.astype(jnp.float32))
        padded.append((w_p, b_p))
        flops_per_row += 2 * cur_in_pad * out_pad
        cur_in_pad = out_pad

    return {
        "layer_names": layer_names,
        "padded_params": padded,
        "in_features": in_feat,
        "in_features_pad": in_pad0,
        "n_classes": n_classes,
        "out_pad": cur_in_pad,
        "flops_per_row": flops_per_row,
    }


# ----------------------------------------------------------------------------
# Pallas kernel: fused (Linear -> activation)* chain on one batch tile
# ----------------------------------------------------------------------------
def build_mlp_kernel(layer_names):
    def kernel(x_ref, *refs):
        out_ref = refs[-1]
        param_refs = refs[:-1]
        h = x_ref[...]  # f32 activations
        p = 0
        for name in layer_names:
            if name == "Linear":
                w_ref = param_refs[p]      # (in_pad, out_pad), bf16, VMEM-resident
                b_ref = param_refs[p + 1]  # (1, out_pad), f32
                p += 2
                h = jnp.dot(h.astype(w_ref.dtype), w_ref[...],
                            preferred_element_type=jnp.float32) + b_ref[...]
            elif name in _ACTS:
                h = _ACTS[name](h)         # elementwise in f32 (cheap on all gens)
            else:
                # TODO(synk): only Linear + elementwise activations are supported in-kernel.
                raise NotImplementedError(name)
        out_ref[...] = h.astype(out_ref.dtype)

    return kernel


# ----------------------------------------------------------------------------
# Wrapper (== MLP.forward): (batch, H, W) -> (batch, nrof_classes)
# ----------------------------------------------------------------------------
def mlp_forward(model, x):
    b = x.shape[0]
    in_feat = model["in_features"]
    in_pad = model["in_features_pad"]
    out_pad = model["out_pad"]
    n_classes = model["n_classes"]

    # nn.Flatten glue (row-major like torch), then pad features/batch.
    x2 = x.reshape(b, -1).astype(jnp.float32)
    tile_b = min(128, _round_up(b, _SUBLANE))      # multiple of 8, capped at 128
    b_pad = _round_up(b, tile_b)
    if (b_pad != b) or (in_pad != in_feat):
        x2 = jnp.pad(x2, ((0, b_pad - b), (0, in_pad - in_feat)))

    kernel = build_mlp_kernel(model["layer_names"])

    args = [x2]
    in_specs = [pl.BlockSpec((tile_b, in_pad), lambda i: (i, 0))]
    param_bytes = 0
    for w_p, b_p in model["padded_params"]:
        args.append(w_p)
        in_specs.append(pl.BlockSpec(w_p.shape, lambda i: (0, 0)))   # VMEM-resident
        args.append(b_p)
        in_specs.append(pl.BlockSpec(b_p.shape, lambda i: (0, 0)))   # VMEM-resident
        param_bytes += w_p.size * w_p.dtype.itemsize + b_p.size * b_p.dtype.itemsize

    out_specs = pl.BlockSpec((tile_b, out_pad), lambda i: (i, 0))
    grid = (b_pad // tile_b,)

    cost = pl.CostEstimate(
        flops=b_pad * model["flops_per_row"],
        transcendentals=0,
        bytes_accessed=x2.size * 4 + param_bytes + b_pad * out_pad * 4,
    )

    out = pl.pallas_call(
        kernel,
        out_shape=jax.ShapeDtypeStruct((b_pad, out_pad), jnp.float32),
        grid=grid,
        in_specs=in_specs,
        out_specs=out_specs,
        compiler_params=pltpu.CompilerParams(
            dimension_semantics=("parallel",),      # 2-TC sharding on v7x
            vmem_limit_bytes=32 * 1024 * 1024,      # fits v7x's smaller VMEM budget
        ),
        cost_estimate=cost,
    )(*args)

    # Strip batch / lane padding outside the kernel (lane-dense stores inside).
    return out[:b, :n_classes]


# Pure-JAX reference for a sanity check
def mlp_ref(cfg, params, x):
    h = x.reshape(x.shape[0], -1).astype(jnp.float32)
    p = 0
    for name, _ in cfg.layers:
        if name == "Flatten":
            continue
        if name == "Linear":
            w, bias = params[p]
            p += 1
            h = h @ w.T + bias
        else:
            h = _ACTS[name](h)
    return h


if __name__ == "__main__":
    key = jax.random.PRNGKey(0)
    key, xk, pk = jax.random.split(key, 3)

    # batch=2, height=16, width=16 -> 256 features -> 32 hidden -> 10 classes
    x = jax.random.normal(xk, (2, 16, 16), dtype=jnp.float32)
    params = init_params(CFG, pk)

    model = prepare_model(CFG, params)                 # one-time prep (hoisted glue)
    fwd = jax.jit(functools.partial(mlp_forward, model))

    out = fwd(x)
    jax.block_until_ready(out)

    ref = mlp_ref(CFG, params, x)
    assert out.shape == (2, 10), out.shape
    # bf16 matmul operands with f32 accumulation -> loose tolerance vs f32 ref.
    assert jnp.allclose(out, ref, atol=5e-2, rtol=5e-2), jnp.max(jnp.abs(out - ref))

    print("KERNEL_OK")
</pallas_src>

<mosaic_0001>
module attributes {stable_mosaic.version = 11 : i64} {
  func.func @kernel(%arg0: i32, %arg1: memref<8x256xf32, #tpu.memory_space<vmem>>, %arg2: memref<256x128xbf16, #tpu.memory_space<vmem>>, %arg3: memref<1x128xf32, #tpu.memory_space<vmem>>, %arg4: memref<128x128xbf16, #tpu.memory_space<vmem>>, %arg5: memref<1x128xf32, #tpu.memory_space<vmem>>, %arg6: memref<8x128xf32, #tpu.memory_space<vmem>>) attributes {dimension_semantics = [#tpu.dimension_semantics<parallel>], iteration_bounds = array<i64: 1>, scalar_prefetch = 0 : i64, scratch_operands = 0 : i64, tpu.core_type = #tpu.core_type<tc>, window_params = [{transform_indices = @transform_0, window_bounds = array<i64: 8, 256>}, {pipeline_mode = #tpu.pipeline_mode<synchronous>, transform_indices = @transform_1, window_bounds = array<i64: 256, 128>}, {pipeline_mode = #tpu.pipeline_mode<synchronous>, transform_indices = @transform_2, window_bounds = array<i64: 1, 128>}, {pipeline_mode = #tpu.pipeline_mode<synchronous>, transform_indices = @transform_3, window_bounds = array<i64: 128, 128>}, {pipeline_mode = #tpu.pipeline_mode<synchronous>, transform_indices = @transform_4, window_bounds = array<i64: 1, 128>}, {transform_indices = @transform_5, window_bounds = array<i64: 8, 128>}]} {
    %c0 = arith.constant 0 : index
    %c0_0 = arith.constant 0 : index
    %0 = vector.load %arg1[%c0, %c0_0] : memref<8x256xf32, #tpu.memory_space<vmem>>, vector<8x256xf32>
    %1 = arith.truncf %0 : vector<8x256xf32> to vector<8x256xbf16>
    %c0_1 = arith.constant 0 : index
    %c0_2 = arith.constant 0 : index
    %2 = vector.load %arg2[%c0_1, %c0_2] : memref<256x128xbf16, #tpu.memory_space<vmem>>, vector<256x128xbf16>
    %cst = arith.constant dense<0.000000e+00> : vector<8x128xf32>
    %3 = tpu.matmul %1, %2, %cst {dimension_numbers = #tpu.dot_dimension_numbers<[1], [0], [0], [1], [0, 0, 1, 1], [], []>} : vector<8x256xbf16>, vector<256x128xbf16>, vector<8x128xf32> -> vector<8x128xf32>
    %c0_3 = arith.constant 0 : index
    %c0_4 = arith.constant 0 : index
    %4 = vector.load %arg3[%c0_3, %c0_4] : memref<1x128xf32, #tpu.memory_space<vmem>>, vector<1x128xf32>
    %5 = vector.broadcast %4 : vector<1x128xf32> to vector<8x128xf32>
    %6 = arith.addf %3, %5 : vector<8x128xf32>
    %cst_5 = arith.constant 0.000000e+00 : f32
    %7 = vector.broadcast %cst_5 : f32 to vector<8x128xf32>
    %8 = arith.maximumf %6, %7 : vector<8x128xf32>
    %9 = arith.truncf %8 : vector<8x128xf32> to vector<8x128xbf16>
    %c0_6 = arith.constant 0 : index
    %c0_7 = arith.constant 0 : index
    %10 = vector.load %arg4[%c0_6, %c0_7] : memref<128x128xbf16, #tpu.memory_space<vmem>>, vector<128x128xbf16>
    %cst_8 = arith.constant dense<0.000000e+00> : vector<8x128xf32>
    %11 = tpu.matmul %9, %10, %cst_8 {dimension_numbers = #tpu.dot_dimension_numbers<[1], [0], [0], [1], [0, 0, 1, 1], [], []>} : vector<8x128xbf16>, vector<128x128xbf16>, vector<8x128xf32> -> vector<8x128xf32>
    %c0_9 = arith.constant 0 : index
    %c0_10 = arith.constant 0 : index
    %12 = vector.load %arg5[%c0_9, %c0_10] : memref<1x128xf32, #tpu.memory_space<vmem>>, vector<1x128xf32>
    %13 = vector.broadcast %12 : vector<1x128xf32> to vector<8x128xf32>
    %14 = arith.addf %11, %13 : vector<8x128xf32>
    %c0_11 = arith.constant 0 : index
    %c0_12 = arith.constant 0 : index
    %15 = vector.load %arg6[%c0_11, %c0_12] : memref<8x128xf32, #tpu.memory_space<vmem>>, vector<8x128xf32>
    tpu.vector_store %arg6[%c0_11, %c0_12], %14 {strides = array<i32>} : memref<8x128xf32, #tpu.memory_space<vmem>>, vector<8x128xf32>,
    return
  }
  func.func @transform_0(%arg0: i32) -> (i32, i32) {
    %c0_i32 = arith.constant 0 : i32
    %c0_i32_0 = arith.constant 0 : i32
    return %arg0, %c0_i32 : i32, i32
  }
  func.func @transform_1(%arg0: i32) -> (i32, i32) {
    %c0_i32 = arith.constant 0 : i32
    %c0_i32_0 = arith.constant 0 : i32
    %c0_i32_1 = arith.constant 0 : i32
    return %c0_i32, %c0_i32_0 : i32, i32
  }
  func.func @transform_2(%arg0: i32) -> (i32, i32) {
    %c0_i32 = arith.constant 0 : i32
    %c0_i32_0 = arith.constant 0 : i32
    %c0_i32_1 = arith.constant 0 : i32
    return %c0_i32, %c0_i32_0 : i32, i32
  }
  func.func @transform_3(%arg0: i32) -> (i32, i32) {
    %c0_i32 = arith.constant 0 : i32
    %c0_i32_0 = arith.constant 0 : i32
    %c0_i32_1 = arith.constant 0 : i32
    return %c0_i32, %c0_i32_0 : i32, i32
  }
  func.func @transform_4(%arg0: i32) -> (i32, i32) {
    %c0_i32 = arith.constant 0 : i32
    %c0_i32_0 = arith.constant 0 : i32
    %c0_i32_1 = arith.constant 0 : i32
    return %c0_i32, %c0_i32_0 : i32, i32
  }
  func.func @transform_5(%arg0: i32) -> (i32, i32) {
    %c0_i32 = arith.constant 0 : i32
    %c0_i32_0 = arith.constant 0 : i32
    return %arg0, %c0_i32 : i32, i32
  }
}

</mosaic_0001>

<bundles_post_ra>
// kernel: mlp_forward.1
= control target key start
LH: loop header
LB: loop body
LE: loop exit
PB: predicated region body
PF: predicated region fallthrough
CT: control target
= control target key end

     0   :  { %10 = vsyncpa [#allocation3], 0  ;;  %s565_s0 = inlined_call_operand.vmem [shape: f32[8,256], index: 0, kind: input, shape index: {}]   ;;  %s566_s1 = inlined_call_operand.hbm [shape: bf16[256,128], index: 1, kind: input, shape index: {}]   ;;  %s567_s2 = inlined_call_operand.vmem [shape: f32[1,128], index: 2, kind: input, shape index: {}, may-alias: {2,4}]   ;;  %s568_s3 = inlined_call_operand.hbm [shape: bf16[128,128], index: 3, kind: input, shape index: {}]   ;;  %s569_s4 = inlined_call_operand.vmem [shape: f32[1,128], index: 4, kind: input, shape index: {}, may-alias: {2,4}]   ;;  %s570_s5 = inlined_call_operand.vmem [shape: f32[8,128], index: 5, kind: output, shape index: {}]  }
   0x1   :  { %11 = vsyncpa [#allocation5], 0  ;;  %s499_s18 = smov [#allocation2]  }
   0x2   :  { %s19_s19 = sshll.u32 %s499_s18, 4  ;;  %s20_s19 = int_to_ptr.vmem [resolvable:$true] %s19_s19 }
   0x3   :  { %s463_s20 = scalar_lea.vmem %s20_s19, 2048  ;;  %p468_p1 = scmp.lt.s32.totalorder %s20_s19, %s20_s19 }
   0x4   :  { %p464_p0 = scmp.ne.s32.totalorder %s20_s19, %s463_s20  ;;  %p469_p2 = scmp.lt.s32.totalorder %s463_s20, %s463_s20 }
   0x6   :  { %p470_p3 = por %p469_p2, %p468_p1 }
   0x8   :  { %p471_p4 = pnand %p470_p3, %p464_p0 }
   0xa   :  { %474 = shalt.err (!%p471_p4)
}
   0xb   :  { %s500_s21 = smov 64   ;;  %s501_s22 = smov 4  }
   0xc   :  { %25 = dma.hbm_to_vmem [thread:$0]  %s566_s1, 2048, %s20_s19, [#allocation3], %s500_s21, %s500_s21, %s501_s22  }
   0xd   :  { %s502_s25 = smov [#allocation4]  }
   0xe   :  { %s33_s26 = sshll.u32 %s502_s25, 4  ;;  %s34_s26 = int_to_ptr.vmem [resolvable:$true] %s33_s26 }
   0xf   :  { %s483_s27 = scalar_lea.vmem %s34_s26, 1024  ;;  %p488_p6 = scmp.lt.s32.totalorder %s34_s26, %s34_s26 }
  0x10   :  { %p484_p5 = scmp.ne.s32.totalorder %s34_s26, %s483_s27  ;;  %p489_p7 = scmp.lt.s32.totalorder %s483_s27, %s483_s27 }
  0x12   :  { %p490_p8 = por %p489_p7, %p488_p6 }
  0x14   :  { %p491_p9 = pnand %p490_p8, %p484_p5 }
  0x16   :  { %494 = shalt.err (!%p491_p9)
}
  0x17   :  { %39 = dma.hbm_to_vmem [thread:$0]  %s568_s3, 1024, %s34_s26, [#allocation5], %s500_s21, %s500_s21, %s501_s22  }
  0x18   :  { %495 = dma.done.wait [#allocation3], 2048  }
  0x19   :  { %496 = vsyncadd [#allocation3], 4294965248 }
  0x1a   :  { %497 = dma.done.wait [#allocation5], 1024  }
  0x1b   :  { %498 = vsyncadd [#allocation5], 4294966272  ;;  %v503_v0 = vmov 0.0   ;;  %v431_v1 = vld [vmem:[#allocation2 + $0x78] sm:$0xff]   ;;  %v433_v3 = vld [vmem:[#allocation2 + $0x70] sm:$0xff]   ;;  %vm504_vm0 = vmmov 0  }
  0x1c   :  { %405 = vmatprep.subr.bf16.mxu1 %v503_v0  ;;  %v432_v2 = vld [vmem:[#allocation2 + $0x38] sm:$0xff]   ;;  %374 = vmatprep.subr.bf16.mxu0 %v431_v1  ;;  %v434_v4 = vld [vmem:[#allocation2 + $0x30] sm:$0xff]   ;;  %v435_v5 = vld [vmem:[#allocation2 + $0x68] sm:$0xff]  }
  0x1d   :  { %375 = vmatpush3.bf16.msra.mxu0 %v432_v2  ;;  %v436_v6 = vld [vmem:[#allocation2 + $0x28] sm:$0xff]   ;;  %v437_v7 = vld [vmem:[#allocation2 + $0x60] sm:$0xff]   ;;  %v439_v9 = vld [vmem:[#allocation2 + $0x58] sm:$0xff]   ;;  %421 = vmatprep.mubr.msk.bf16.mxu1 %vm504_vm0, %v503_v0 }
  0x1e   :  { %376 = vmatprep.subr.bf16.mxu0 %v433_v3  ;;  %v438_v8 = vld [vmem:[#allocation2 + $0x20] sm:$0xff]   ;;  %v440_v10 = vld [vmem:[#allocation2 + $0x18] sm:$0xff]   ;;  %v441_v11 = vld [vmem:[#allocation2 + $0x50] sm:$0xff]  }
  0x1f   :  { %v50_v12 = vld [vmem:[%s565_s0 + $0x8] sm:$0xff]  ;;  %v447_v14 = vld [vmem:[#allocation4 + $0x38] sm:$0xff]   ;;  %v442_v15 = vld [vmem:[#allocation2 + $0x10] sm:$0xff]  }
  0x20   :  { %v52_v13 = vpack.c.bf16 %v50_v12, %v50_v12  ;;  %v443_v16 = vld [vmem:[#allocation2 + $0x48] sm:$0xff]   ;;  %406 = vmatpush3.bf16.msra.mxu1 %v447_v14  ;;  %v448_v17 = vld [vmem:[#allocation4 + $0x30] sm:$0xff]   ;;  %v445_v19 = vld [vmem:[#allocation2 + $0x40] sm:$0xff]  }
  0x21   :  { %377 = vmatpush3.bf16.msra.mxu0 %v434_v4  ;;  %407 = vmatprep.subr.bf16.mxu1 %v503_v0  ;;  %v444_v18 = vld [vmem:[#allocation2 + $0x8] sm:$0xff]   ;;  %v446_v21 = vld [vmem:[#allocation2] sm:$0xff]   ;;  %v451_v25 = vld [vmem:[#allocation4 + $0x18] sm:$0xff]  }
  0x22   :  { %378 = vmatprep.subr.bf16.mxu0 %v435_v5  ;;  %220 = vmatprep.mubr.bf16.mxu0 %v52_v13  ;;  %v449_v20 = vld [vmem:[#allocation4 + $0x28] sm:$0xff]   ;;  %v49_v22 = vld [vmem:[%s565_s0] sm:$0xff]  ;;  %v452_v26 = vld [vmem:[#allocation4 + $0x10] sm:$0xff]  }
  0x23   :  { %v450_v23 = vld [vmem:[#allocation4 + $0x20] sm:$0xff]   ;;  %v51_v24 = vpack.c.bf16 %v49_v22, %v49_v22  ;;  %v453_v27 = vld [vmem:[#allocation4 + $0x8] sm:$0xff]  }
  0x24   :  { %408 = vmatpush3.bf16.msra.mxu1 %v448_v17  ;;  %v454_v28 = vld [vmem:[#allocation4] sm:$0xff]  }
  0x25   :  { %379 = vmatpush3.bf16.msra.mxu0 %v436_v6  ;;  %409 = vmatprep.subr.bf16.mxu1 %v503_v0  ;;  %v348_v30 = vld [vmem:[%s567_s2] ss:$0 sm:$0xff] }
  0x26   :  { %380 = vmatprep.subr.bf16.mxu0 %v437_v7  ;;  %v365_v38 = vld [vmem:[%s569_s4] ss:$0 sm:$0xff] }
  0x28   :  { %410 = vmatpush3.bf16.msra.mxu1 %v449_v20 }
  0x29   :  { %381 = vmatpush3.bf16.msra.mxu0 %v438_v8  ;;  %411 = vmatprep.subr.bf16.mxu1 %v503_v0 }
  0x2a   :  { %382 = vmatprep.subr.bf16.mxu0 %v439_v9 }
  0x2c   :  { %412 = vmatpush3.bf16.msra.mxu1 %v450_v23 }
  0x2d   :  { %383 = vmatpush3.bf16.msra.mxu0 %v440_v10  ;;  %413 = vmatprep.subr.bf16.mxu1 %v503_v0 }
  0x2e   :  { %384 = vmatprep.subr.bf16.mxu0 %v441_v11 }
  0x30   :  { %414 = vmatpush3.bf16.msra.mxu1 %v451_v25 }
  0x31   :  { %385 = vmatpush3.bf16.msra.mxu0 %v442_v15  ;;  %415 = vmatprep.subr.bf16.mxu1 %v503_v0 }
  0x32   :  { %386 = vmatprep.subr.bf16.mxu0 %v443_v16 }
  0x34   :  { %416 = vmatpush3.bf16.msra.mxu1 %v452_v26 }
  0x35   :  { %387 = vmatpush3.bf16.msra.mxu0 %v444_v18  ;;  %417 = vmatprep.subr.bf16.mxu1 %v503_v0 }
  0x36   :  { %388 = vmatprep.subr.bf16.mxu0 %v445_v19 }
  0x38   :  { %418 = vmatpush3.bf16.msra.mxu1 %v453_v27 }
  0x39   :  { %389 = vmatpush3.bf16.msra.mxu0 %v446_v21  ;;  %419 = vmatprep.subr.bf16.mxu1 %v503_v0 }
  0x3c   :  { %221 = vmatmul.mubr.bf16.vlgmr.msra.gmra.mxu0 %v51_v24  ;;  %420 = vmatpush3.bf16.msra.mxu1 %v454_v28 }
  0xfc   :  { %v390_v29 = vpop.f32.mrf.mxu0 }
  0xfe   :  { %v391_v31 = vpop.f32.mrf.mxu0 }
  0xff   :  { %v392_v32 = vadd.f32 %v391_v31, %v390_v29 }
 0x100   :  { %v393_v33 = vpop.f32.mrf.mxu0 }
 0x101   :  { %v223_v34 = vadd.f32 %v392_v32, %v348_v30 }
 0x102   :  { %v394_v35 = vpop.f32.mrf.mxu0 }
 0x103   :  { %v228_v36 = vmax.f32 %v223_v34, 0.0 }
 0x105   :  { %v229_v37 = vpack.c.bf16 %v228_v36, %v228_v36 }
 0x107   :  { %422 = vmatmul.mubr.bf16.vlgmr.msra.gmra.mxu1 %v229_v37 }
 0x1c7   :  { %v335_v39 = vpop.f32.mrf.mxu1 }
 0x1c8   :  { %v336_v40 = vadd.f32 %v365_v38, %v335_v39 }
 0x1c9   :  { %v423_v41 = vpop.f32.mrf.mxu1 }
 0x1ca   :  { %341 = vst [vmem:[%s570_s5] sm:$0xff] %v336_v40 }
 0x1cb   :  { %v338_v42 = vpop.f32.mrf.mxu1 }
 0x1cd   :  { %v424_v43 = vpop.f32.mrf.mxu1 }
 0x1ce   :  { %346 = vsyncpa [#allocation3], 1 }
 0x1cf   :  { %347 = vsyncpa [#allocation5], 1 }

</bundles_post_ra>
